<compile_context>
chip_gen: v5e
topology: v5e:2x2
jax: 0.10.0
libtpu: 0.0.40
codegen_flags: <defaults>
</compile_context>

<pallas_src>
import jax
import jax.numpy as jnp
import numpy as np
from jax.experimental import pallas as pl
from jax.experimental.pallas import tpu as pltpu


# Below this size a pallas_call launch costs far more than the bytes it could move.
_FAST_PATH_BYTES = 1 << 20  # 1 MiB


# --------------------------------------------------------------------------- #
# Zero-copy path: output HBM buffer aliases the parameter buffer.             #
# --------------------------------------------------------------------------- #
def _alias_passthrough_kernel(tex_hbm_ref, o_hbm_ref):
    # Output aliases the input (input_output_aliases={0: 0}); the texture values
    # are already in place, so no DMA / vld / vst is issued.  touch() just pins a
    # dependency on the aliased output so nothing gets reordered/elided.
    pltpu.touch(o_hbm_ref)


def _alias_passthrough(tex):
    return pl.pallas_call(
        _alias_passthrough_kernel,
        out_shape=jax.ShapeDtypeStruct(tex.shape, tex.dtype),
        in_specs=[pl.BlockSpec(memory_space=pl.ANY)],
        out_specs=pl.BlockSpec(memory_space=pl.ANY),
        input_output_aliases={0: 0},
    )(tex)


# --------------------------------------------------------------------------- #
# Fallback path: tiled, pipelined, lane-dense HBM->VMEM->HBM copy.            #
# --------------------------------------------------------------------------- #
def _tex_copy_kernel(tex_ref, o_ref):
    # tex_ref / o_ref: (TH, L) VMEM tiles of the flattened texture.
    o_ref[...] = tex_ref[...]


def _lane_dense_2d(n_elems):
    """(rows, cols) view of the flat texture with cols a multiple of 128, if any."""
    for lanes in (4096, 2048, 1024, 512, 256, 128):
        if n_elems % lanes == 0:
            return n_elems // lanes, lanes
    return None


def _vmem_budget():
    """(per-tile byte cap, scoped vmem_limit_bytes) sized from the real chip."""
    try:
        cap = int(getattr(pltpu.get_tpu_info(), "vmem_capacity_bytes",
                          64 * 1024 * 1024))
    except Exception:
        cap = 64 * 1024 * 1024  # conservative: assume v7x (64 MiB per TC)
    if cap >= 128 * 1024 * 1024:       # v5e / v6e
        return 8 * 1024 * 1024, 64 * 1024 * 1024
    return 4 * 1024 * 1024, 48 * 1024 * 1024   # v7x


def _pick_row_tile(rows, cols, itemsize, tile_cap_bytes):
    """Largest multiple-of-8 row tile under tile_cap_bytes, with >= 2 grid steps."""
    if rows <= 8:
        return rows                      # full-extent block along rows is legal
    row_bytes = cols * itemsize
    th = min(rows, max(1, tile_cap_bytes // row_bytes))
    th = max(8, (th // 8) * 8)           # (8, 128) sublane tiling constraint
    # Keep the "parallel" grid axis >= 2 iterations so both v7x TCs get work.
    while pl.cdiv(rows, th) < 2 and th > 8:
        th = max(8, ((th // 2) // 8) * 8)
    # TODO(synk): for pathological fallback slabs (cols*4B*8 rows > tile cap, i.e.
    # W*3 > ~256K and not a multiple of 128) a second column grid axis would be
    # needed; realistic texture atlases never hit this.
    return th


def _tiled_copy(tex):
    one, h, w, c = tex.shape
    n = h * w * c
    view = _lane_dense_2d(n)
    if view is not None:
        rows, cols = view            # cols multiple of 128 -> unmasked lane-dense vst
    else:
        rows, cols = h, w * c        # fallback: original slab layout
    tex2d = tex.reshape(rows, cols)  # contiguous view, free

    tile_cap, vmem_limit = _vmem_budget()
    th = _pick_row_tile(rows, cols, tex2d.dtype.itemsize, tile_cap)
    grid = (pl.cdiv(rows, th),)

    # Note: no input_output_aliases here on purpose — if the operand cannot be
    # donated, XLA would insert a protective copy and double the HBM traffic.
    out2d = pl.pallas_call(
        _tex_copy_kernel,
        out_shape=jax.ShapeDtypeStruct((rows, cols), tex2d.dtype),
        grid=grid,
        in_specs=[pl.BlockSpec((th, cols), lambda i: (i, 0))],
        out_specs=pl.BlockSpec((th, cols), lambda i: (i, 0)),
        compiler_params=pltpu.CompilerParams(
            dimension_semantics=("parallel",),   # shard row tiles across v7x TCs
            vmem_limit_bytes=vmem_limit,
        ),
    )(tex2d)
    return out2d.reshape(1, h, w, c)


# --------------------------------------------------------------------------- #
# TexG.forward                                                                #
# --------------------------------------------------------------------------- #
def tex_g_forward(tex, placeholder=None):
    """Forward of TexG: returns the texture parameter; `placeholder` is ignored.

    tex        : (1, H, W, 3) float32 in [-1, 1]  (the registered nn.Parameter)
    placeholder: any array (unused, matching TexG.forward's signature)
    """
    del placeholder  # TexG.forward ignores its input.
    one, h, w, c = tex.shape
    assert one == 1 and c == 3, f"unexpected tex shape {tex.shape}"

    nbytes = tex.size * tex.dtype.itemsize
    if nbytes < _FAST_PATH_BYTES:
        # Identity on the parameter: fastest correct implementation is no kernel.
        return tex

    try:
        # Zero HBM traffic: the output buffer aliases the parameter buffer.
        out = _alias_passthrough(tex)
        return jax.block_until_ready(out)  # surface any runtime issue inside the guard
    except Exception:
        # Portability guard: fall back to the bandwidth-optimal tiled copy.
        return _tiled_copy(tex)


if __name__ == "__main__":
    key = jax.random.PRNGKey(0)
    k_img, k_ph = jax.random.split(key)

    # TODO(synk): TexG.__init__ loads the texture with Image.open(mtl_f); file I/O is
    # not allowed here, so build a deterministic synthetic [0, 255] image instead.
    # Shape chosen small but just above the fast-path cutoff so the Pallas paths run.
    H, W, C = 256, 384, 3
    mtl_imgs = jax.random.randint(k_img, (H, W, C), 0, 256).astype(jnp.float32)

    # __init__ preprocessing (from_scratch=False): [0, 255] -> [-1, 1], add batch dim.
    init_tex = (mtl_imgs / 255.0 * 2.0 - 1.0).reshape(1, H, W, C)

    # Placeholder argument (ignored by forward, as in the PyTorch module).
    placeholder = jax.random.normal(k_ph, (2, 4), dtype=jnp.float32)

    # 1) Default forward: zero-copy aliased passthrough kernel for this texture.
    y = jax.block_until_ready(tex_g_forward(init_tex, placeholder))
    assert y.shape == (1, H, W, C)
    np.testing.assert_array_equal(np.asarray(y), np.asarray(init_tex))

    # 2) Explicit tiled lane-dense copy kernel (portability / bandwidth path).
    y2 = jax.block_until_ready(_tiled_copy(init_tex))
    np.testing.assert_array_equal(np.asarray(y2), np.asarray(init_tex))

    # 3) Tiny-texture fast path (16x16 atlas, module-scale test): no kernel at all.
    tiny = init_tex[:, :16, :16, :]
    y3 = jax.block_until_ready(tex_g_forward(tiny, placeholder))
    np.testing.assert_array_equal(np.asarray(y3), np.asarray(tiny))

    # output_range == 'pm1'
    assert float(jnp.min(y)) >= -1.0 and float(jnp.max(y)) <= 1.0

    print("KERNEL_OK")
</pallas_src>

<mosaic_0001>
module attributes {stable_mosaic.version = 11 : i64} {
  func.func @_alias_passthrough_kernel(%arg0: memref<1x256x384x3xf32, #tpu.memory_space<any>>, %arg1: memref<1x256x384x3xf32, #tpu.memory_space<any>>) attributes {dimension_semantics = [], scalar_prefetch = 0 : i64, scratch_operands = 0 : i64, tpu.core_type = #tpu.core_type<tc>} {
    return
  }
}

module attributes {stable_mosaic.version = 11 : i64} {
  func.func @_tex_copy_kernel(%arg0: i32, %arg1: memref<32x4096xf32, #tpu.memory_space<vmem>>, %arg2: memref<32x4096xf32, #tpu.memory_space<vmem>>) attributes {dimension_semantics = [#tpu.dimension_semantics<parallel>], iteration_bounds = array<i64: 3>, scalar_prefetch = 0 : i64, scratch_operands = 0 : i64, tpu.core_type = #tpu.core_type<tc>, window_params = [{transform_indices = @transform_0, window_bounds = array<i64: 32, 4096>}, {transform_indices = @transform_1, window_bounds = array<i64: 32, 4096>}]} {
    %c0 = arith.constant 0 : index
    %c0_0 = arith.constant 0 : index
    %0 = vector.load %arg1[%c0, %c0_0] : memref<32x4096xf32, #tpu.memory_space<vmem>>, vector<32x4096xf32>
    %c0_1 = arith.constant 0 : index
    %c0_2 = arith.constant 0 : index
    %1 = vector.load %arg2[%c0_1, %c0_2] : memref<32x4096xf32, #tpu.memory_space<vmem>>, vector<32x4096xf32>
    tpu.vector_store %arg2[%c0_1, %c0_2], %0 {strides = array<i32>} : memref<32x4096xf32, #tpu.memory_space<vmem>>, vector<32x4096xf32>,
    return
  }
  func.func @transform_0(%arg0: i32) -> (i32, i32) {
    %c0_i32 = arith.constant 0 : i32
    %c0_i32_0 = arith.constant 0 : i32
    return %arg0, %c0_i32 : i32, i32
  }
  func.func @transform_1(%arg0: i32) -> (i32, i32) {
    %c0_i32 = arith.constant 0 : i32
    %c0_i32_0 = arith.constant 0 : i32
    return %arg0, %c0_i32 : i32, i32
  }
}

</mosaic_0001>

<bundles_post_ra>
// kernel: tpu_custom_call.1
= control target key start
LH: loop header
LB: loop body
LE: loop exit
PB: predicated region body
PF: predicated region fallthrough
CT: control target
= control target key end

     0   :  { %s16_s0 = inlined_call_operand.vmem [shape: f32[1,256,384,3], index: 0, kind: input, shape index: {}, may-alias: {0,1}]   ;;  %s17_s1 = inlined_call_operand.vmem [shape: f32[1,256,384,3], index: 1, kind: output, shape index: {}, may-alias: {0,1}]  }

// kernel: tpu_custom_call.1
= control target key start
LH: loop header
LB: loop body
LE: loop exit
PB: predicated region body
PF: predicated region fallthrough
CT: control target
= control target key end

     0   :  { %6 = vsyncpa [#allocation3], 0  ;;  %s1152_s0 = inlined_call_operand.hbm [shape: f32[72,4096], index: 0, kind: input, shape index: {}]   ;;  %s1153_s1 = inlined_call_operand.hbm [shape: f32[72,4096], index: 1, kind: output, shape index: {}]  }
   0x1   :  { %8 = vsyncpa [#allocation3 + $0x1], 0 }
   0x2   :  { %9 = vsyncpa [#allocation4], 0 }
   0x3   :  { %11 = vsyncpa [#allocation4 + $0x1], 0  ;;  %s721_s6 = smov 0   ;;  %s723_s7 = smov 0  }
   0x4   :  { %s725_s8 = smov 0   ;;  %s727_s9 = smov 0  }
   0x5 LB: > { %s742_s10 = sadd.s32 4294967295, %s703_s9   ;;  %s512_s11 = sadd.s32 4294967294, %s703_s9   ;;  %s703_s9 = sphi %s727_s9, %s1162_s9   ;;  %s699_s8 = sphi %s725_s8, %s1161_s8   ;;  %s695_s7 = sphi %s723_s7, %s1160_s7   ;;  %s691_s6 = sphi %s721_s6, %s1159_s6  }
   0x6   : > { %s746_s12 = sadd.s32 1, %s703_s9   ;;  %s24_s13 = sadd.s32 1, %s699_s8 }
   0x7   : > { %s21_s14 = ssub.s32 %s703_s9, %s746_s12  ;;  %p31_p0 = scmp.ne.s32.totalorder %s699_s8, %s695_s7 }
   0x8   : > { %p22_p1 = scmp.eq.s32.totalorder %s21_s14, 0  ;;  %p32_p2 = scmp.eq.s32.totalorder %s703_s9, 0 }
   0x9   : > { %p37_p3 = scmp.ne.s32.totalorder %s695_s7, %s691_s6  ;;  %p38_p4 = scmp.eq.s32.totalorder %s742_s10, 0 }
   0xa   : > { %s758_s15 = scalar_select %p22_p1, %s699_s8, %s24_s13  }
   0xb   : > { %p33_p5 = por %p32_p2, %p31_p0  ;;  %p760_p6 = por %p38_p4, %p37_p3 }
   0xc   : > { %p61_p7 = scmp.eq.s32.totalorder %s742_s10, 2  ;;  %p67_p8 = scmp.eq.s32.totalorder %s512_s11, 2 }
   0xd   : > { %p514_p11 = scmp.ge.s32.totalorder %s703_s9, 3 }
   0xe   : > { %p765_p9 = por %p61_p7, %p31_p0  ;;  %p769_p10 = por %p67_p8, %p37_p3 }
   0xf   : > { %83 = sbr.rel (%p514_p11) target bundleno = 56 (0x38), region = 16 }
  0x14   : > { %86 = sbr.rel (!%p33_p5) target bundleno = 56 (0x38), region = 20  ;;  %s87_s19 = sand.u32 (%p33_p5), 1, %s699_s8  }
  0x15   : > { %s516_s20 = sshll.u32 (%p33_p5), %s703_s9, 2  ;;  %s515_s21 = sshll.u32 (%p33_p5), %s87_s19, 10 }
  0x16   : > { %s93_s22 = ssub.s32 (%p33_p5), 9, %s516_s20  ;;  %s779_s26 = scalar_lea.sflag (%p33_p5), [#allocation3], %s87_s19 }
  0x17   : > { %p94_p12 = scmp.lt.s32.totalorder (%p33_p5), %s93_s22, 4  ;;  %s91_s27 = scalar_lea.vmem (%p33_p5), [#allocation2], %s515_s21 }
  0x19   : > { %s1164_s22 = smov (!%p94_p12, %s93_s22), 4 }
  0x1a   : > { %s538_s23 = sshll.u32 %s1164_s22, 8 }
  0x1b   : > { %s98_s24 = ssub.s32 1024, %s538_s23 }
  0x1c   : > { %s99_s25 = sshll.u32 %s98_s24, 4 }
  0x1d   : > { %100 = vsyncadd %s779_s26, %s99_s25  ;;  %p782_p13 = scmp.ne.s32.totalorder %s538_s23, 0  ;;  %s540_s29 = sshll.u32 %s703_s9, 10 }
  0x1e   : > { %s104_s3 = scalar_lea.hbm %s1152_s0, %s540_s29  ;;  %s790_s4 = sshll.u32 %s91_s27, 4  ;;  %s109_s4 = int_to_ptr.vmem [resolvable:$true] %s790_s4 }
  0x1f   : > { %s106_s5 = sshll.u32 %s104_s3, 4  ;;  %s523_s11 = sshll.u32 %s1164_s22, 12  ;;  %s793_s5 = int_to_ptr.hbm [resolvable:$true] %s106_s5 }
  0x20   : > { %s587_s13 = sshra.s32 %s793_s5, 4  ;;  %s589_s14 = sshrl.u32 %s523_s11, 4  ;;  %s588_s13 = int_to_ptr.hbm [resolvable:$true] %s587_s13 }
  0x21   : > { %s594_s19 = scalar_lea.hbm %s588_s13, %s589_s14  ;;  %s598_s23 = scalar_lea.hbm %s1152_s0, 2304 }
  0x22   : > { %p595_p0 = scmp.ne.s32.totalorder %s588_s13, %s594_s19  ;;  %p599_p3 = scmp.lt.s32.totalorder %s588_s13, %s1152_s0 }
  0x23   : > { %p600_p4 = scmp.lt.s32.totalorder %s598_s23, %s594_s19 }
  0x24   : > { %p596_p1 = pnand %p595_p0, %p782_p13 }
  0x25   : > { %p601_p5 = por %p600_p4, %p599_p3 }
  0x26   : > { %p597_p2 = pneg %p596_p1 }
  0x28   : > { %p602_p7 = pnand %p601_p5, %p597_p2 }
  0x2a   : > { %605 = shalt.err (!%p602_p7)
}
  0x2b   : > { %s606_s27 = sshra.s32 %s109_s4, 4  ;;  %s705_s30 = smov [#allocation2]   ;;  %s607_s27 = int_to_ptr.vmem [resolvable:$true] %s606_s27 }
  0x2c   : > { %s613_s29 = scalar_lea.vmem %s607_s27, %s589_s14  ;;  %s617_s2 = scalar_lea.vmem %s705_s30, 2048 }
  0x2d   : > { %p614_p8 = scmp.ne.s32.totalorder %s607_s27, %s613_s29  ;;  %p619_p0 = scmp.lt.s32.totalorder %s617_s2, %s613_s29 }
  0x2f   : > { %p615_p11 = pnand %p614_p8, %p782_p13 }
  0x31   : > { %p616_p12 = pneg %p615_p11 }
  0x33   : > { %p621_p1 = pnand %p619_p0, %p616_p12 }
  0x35   : > { %624 = shalt.err (!%p621_p1)
}
  0x36   : > { %s706_s3 = smov 4096   ;;  %s707_s13 = smov 256  }
  0x37   : > { %114 = dma.hbm_to_vmem [thread:$0]  (%p782_p13), %s793_s5, %s523_s11, %s109_s4, %s779_s26, %s706_s3, %s706_s3, %s707_s13  }
  0x38 PF: > { %p524_p2 = scmp.ge.s32.totalorder %s703_s9, 1  ;;  %p116_p3 = scmp.lt.s32.totalorder %s703_s9, 4 }
  0x3a   : > { %p117_p4 = pnand %p524_p2, %p116_p3 }
  0x3b   : > { %s822_s14 = sand.u32 (!%p117_p4), 1, %s695_s7  }
  0x3c   : > { %120 = sbr.rel (%p117_p4) target bundleno = 226 (0xe2), region = 24  ;;  %s525_s19 = sshll.u32 (!%p117_p4), %s822_s14, 10 }
  0x3d   : > { %s123_s20 = scalar_lea.sflag (!%p117_p4), [#allocation3], %s822_s14  ;;  %s826_s28 = scalar_lea.vmem (!%p117_p4), [#allocation2], %s525_s19 }
  0x41   : > { %682 = dma.done.wait (%p760_p6), %s123_s20, 16384  }
  0x42   : > { %684 = vsyncadd (%p760_p6), %s123_s20, 4294950912  ;;  %v158_v0 = vld [vmem:[%s826_s28] sm:$0xff]  ;;  %v159_v1 = vld [vmem:[%s826_s28 + $0x8] sm:$0xff]  ;;  %s835_s22 = scalar_lea.vmem [#allocation5], %s525_s19  ;;  %s415_s16 = scalar_lea.sflag [#allocation4], %s822_s14 }
  0x43   : > { %v160_v2 = vld [vmem:[%s826_s28 + $0x10] sm:$0xff]  ;;  %286 = vst [vmem:[%s835_s22] sm:$0xff] %v158_v0  ;;  %v161_v3 = vld [vmem:[%s826_s28 + $0x18] sm:$0xff]  ;;  %v162_v4 = vld [vmem:[%s826_s28 + $0x20] sm:$0xff]  ;;  %s528_s26 = sshll.u32 (%p765_p9), %s742_s10, 2 }
  0x44   : > { %287 = vst [vmem:[%s835_s22 + $0x8] sm:$0xff] %v159_v1  ;;  %v163_v5 = vld [vmem:[%s826_s28 + $0x28] sm:$0xff]  ;;  %v164_v6 = vld [vmem:[%s826_s28 + $0x30] sm:$0xff]  ;;  %v165_v7 = vld [vmem:[%s826_s28 + $0x38] sm:$0xff]  ;;  %s423_s4 = ssub.s32 (%p765_p9), 9, %s528_s26 }
  0x45   : > { %288 = vst [vmem:[%s835_s22 + $0x10] sm:$0xff] %v160_v2  ;;  %v166_v8 = vld [vmem:[%s826_s28 + $0x40] sm:$0xff]  ;;  %v167_v9 = vld [vmem:[%s826_s28 + $0x48] sm:$0xff]  ;;  %v168_v10 = vld [vmem:[%s826_s28 + $0x50] sm:$0xff]  ;;  %p424_p6 = scmp.lt.s32.totalorder (%p765_p9), %s423_s4, 4 }
  0x46   : > { %289 = vst [vmem:[%s835_s22 + $0x18] sm:$0xff] %v161_v3  ;;  %v169_v11 = vld [vmem:[%s826_s28 + $0x58] sm:$0xff]  ;;  %v170_v12 = vld [vmem:[%s826_s28 + $0x60] sm:$0xff]  ;;  %v171_v13 = vld [vmem:[%s826_s28 + $0x68] sm:$0xff] }
  0x47   : > { %290 = vst [vmem:[%s835_s22 + $0x20] sm:$0xff] %v162_v4  ;;  %v172_v14 = vld [vmem:[%s826_s28 + $0x70] sm:$0xff]  ;;  %v173_v15 = vld [vmem:[%s826_s28 + $0x78] sm:$0xff]  ;;  %v174_v16 = vld [vmem:[%s826_s28 + $0x80] sm:$0xff] }
  0x48   : > { %291 = vst [vmem:[%s835_s22 + $0x28] sm:$0xff] %v163_v5  ;;  %v175_v17 = vld [vmem:[%s826_s28 + $0x88] sm:$0xff]  ;;  %v176_v18 = vld [vmem:[%s826_s28 + $0x90] sm:$0xff]  ;;  %v177_v19 = vld [vmem:[%s826_s28 + $0x98] sm:$0xff] }
  0x49   : > { %292 = vst [vmem:[%s835_s22 + $0x30] sm:$0xff] %v164_v6  ;;  %v178_v20 = vld [vmem:[%s826_s28 + $0xa0] sm:$0xff]  ;;  %v179_v21 = vld [vmem:[%s826_s28 + $0xa8] sm:$0xff]  ;;  %v180_v22 = vld [vmem:[%s826_s28 + $0xb0] sm:$0xff] }
  0x4a   : > { %293 = vst [vmem:[%s835_s22 + $0x38] sm:$0xff] %v165_v7  ;;  %v181_v23 = vld [vmem:[%s826_s28 + $0xb8] sm:$0xff]  ;;  %v182_v24 = vld [vmem:[%s826_s28 + $0xc0] sm:$0xff]  ;;  %v183_v25 = vld [vmem:[%s826_s28 + $0xc8] sm:$0xff] }
  0x4b   : > { %294 = vst [vmem:[%s835_s22 + $0x40] sm:$0xff] %v166_v8  ;;  %v184_v26 = vld [vmem:[%s826_s28 + $0xd0] sm:$0xff]  ;;  %v185_v27 = vld [vmem:[%s826_s28 + $0xd8] sm:$0xff]  ;;  %v186_v28 = vld [vmem:[%s826_s28 + $0xe0] sm:$0xff] }
  0x4c   : > { %295 = vst [vmem:[%s835_s22 + $0x48] sm:$0xff] %v167_v9  ;;  %v187_v29 = vld [vmem:[%s826_s28 + $0xe8] sm:$0xff]  ;;  %v188_v30 = vld [vmem:[%s826_s28 + $0xf0] sm:$0xff]  ;;  %v189_v31 = vld [vmem:[%s826_s28 + $0xf8] sm:$0xff] }
  0x4d   : > { %296 = vst [vmem:[%s835_s22 + $0x50] sm:$0xff] %v168_v10  ;;  %v190_v32 = vld [vmem:[%s826_s28 + $0x100] sm:$0xff]  ;;  %v191_v33 = vld [vmem:[%s826_s28 + $0x108] sm:$0xff]  ;;  %v192_v34 = vld [vmem:[%s826_s28 + $0x110] sm:$0xff] }
  0x4e   : > { %297 = vst [vmem:[%s835_s22 + $0x58] sm:$0xff] %v169_v11  ;;  %v193_v35 = vld [vmem:[%s826_s28 + $0x118] sm:$0xff]  ;;  %v194_v36 = vld [vmem:[%s826_s28 + $0x120] sm:$0xff]  ;;  %v195_v37 = vld [vmem:[%s826_s28 + $0x128] sm:$0xff] }
  0x4f   : > { %298 = vst [vmem:[%s835_s22 + $0x60] sm:$0xff] %v170_v12  ;;  %v196_v38 = vld [vmem:[%s826_s28 + $0x130] sm:$0xff]  ;;  %v197_v39 = vld [vmem:[%s826_s28 + $0x138] sm:$0xff]  ;;  %v198_v40 = vld [vmem:[%s826_s28 + $0x140] sm:$0xff] }
  0x50   : > { %299 = vst [vmem:[%s835_s22 + $0x68] sm:$0xff] %v171_v13  ;;  %v199_v41 = vld [vmem:[%s826_s28 + $0x148] sm:$0xff]  ;;  %v200_v42 = vld [vmem:[%s826_s28 + $0x150] sm:$0xff]  ;;  %v201_v43 = vld [vmem:[%s826_s28 + $0x158] sm:$0xff] }
  0x51   : > { %300 = vst [vmem:[%s835_s22 + $0x70] sm:$0xff] %v172_v14  ;;  %v202_v44 = vld [vmem:[%s826_s28 + $0x160] sm:$0xff]  ;;  %v203_v45 = vld [vmem:[%s826_s28 + $0x168] sm:$0xff]  ;;  %v204_v46 = vld [vmem:[%s826_s28 + $0x170] sm:$0xff] }
  0x52   : > { %301 = vst [vmem:[%s835_s22 + $0x78] sm:$0xff] %v173_v15  ;;  %v205_v47 = vld [vmem:[%s826_s28 + $0x178] sm:$0xff]  ;;  %v206_v48 = vld [vmem:[%s826_s28 + $0x180] sm:$0xff]  ;;  %v207_v49 = vld [vmem:[%s826_s28 + $0x188] sm:$0xff] }
  0x53   : > { %302 = vst [vmem:[%s835_s22 + $0x80] sm:$0xff] %v174_v16  ;;  %v208_v50 = vld [vmem:[%s826_s28 + $0x190] sm:$0xff]  ;;  %v209_v51 = vld [vmem:[%s826_s28 + $0x198] sm:$0xff]  ;;  %v210_v52 = vld [vmem:[%s826_s28 + $0x1a0] sm:$0xff] }
  0x54   : > { %303 = vst [vmem:[%s835_s22 + $0x88] sm:$0xff] %v175_v17  ;;  %v211_v53 = vld [vmem:[%s826_s28 + $0x1a8] sm:$0xff]  ;;  %v212_v54 = vld [vmem:[%s826_s28 + $0x1b0] sm:$0xff]  ;;  %v213_v55 = vld [vmem:[%s826_s28 + $0x1b8] sm:$0xff] }
  0x55   : > { %304 = vst [vmem:[%s835_s22 + $0x90] sm:$0xff] %v176_v18  ;;  %v214_v56 = vld [vmem:[%s826_s28 + $0x1c0] sm:$0xff]  ;;  %v215_v57 = vld [vmem:[%s826_s28 + $0x1c8] sm:$0xff]  ;;  %v216_v58 = vld [vmem:[%s826_s28 + $0x1d0] sm:$0xff] }
  0x56   : > { %305 = vst [vmem:[%s835_s22 + $0x98] sm:$0xff] %v177_v19  ;;  %v217_v59 = vld [vmem:[%s826_s28 + $0x1d8] sm:$0xff]  ;;  %v218_v60 = vld [vmem:[%s826_s28 + $0x1e0] sm:$0xff]  ;;  %v219_v61 = vld [vmem:[%s826_s28 + $0x1e8] sm:$0xff] }
  0x57   : > { %306 = vst [vmem:[%s835_s22 + $0xa0] sm:$0xff] %v178_v20  ;;  %v220_v62 = vld [vmem:[%s826_s28 + $0x1f0] sm:$0xff]  ;;  %v221_v63 = vld [vmem:[%s826_s28 + $0x1f8] sm:$0xff]  ;;  %v222_v0 = vld [vmem:[%s826_s28 + $0x200] sm:$0xff] }
  0x58   : > { %307 = vst [vmem:[%s835_s22 + $0xa8] sm:$0xff] %v179_v21  ;;  %v223_v1 = vld [vmem:[%s826_s28 + $0x208] sm:$0xff]  ;;  %v224_v2 = vld [vmem:[%s826_s28 + $0x210] sm:$0xff]  ;;  %v225_v3 = vld [vmem:[%s826_s28 + $0x218] sm:$0xff] }
  0x59   : > { %308 = vst [vmem:[%s835_s22 + $0xb0] sm:$0xff] %v180_v22  ;;  %v226_v4 = vld [vmem:[%s826_s28 + $0x220] sm:$0xff]  ;;  %v227_v5 = vld [vmem:[%s826_s28 + $0x228] sm:$0xff]  ;;  %v228_v6 = vld [vmem:[%s826_s28 + $0x230] sm:$0xff] }
  0x5a   : > { %309 = vst [vmem:[%s835_s22 + $0xb8] sm:$0xff] %v181_v23  ;;  %v229_v7 = vld [vmem:[%s826_s28 + $0x238] sm:$0xff]  ;;  %v230_v8 = vld [vmem:[%s826_s28 + $0x240] sm:$0xff]  ;;  %v231_v9 = vld [vmem:[%s826_s28 + $0x248] sm:$0xff] }
  0x5b   : > { %310 = vst [vmem:[%s835_s22 + $0xc0] sm:$0xff] %v182_v24  ;;  %v232_v10 = vld [vmem:[%s826_s28 + $0x250] sm:$0xff]  ;;  %v233_v11 = vld [vmem:[%s826_s28 + $0x258] sm:$0xff]  ;;  %v234_v12 = vld [vmem:[%s826_s28 + $0x260] sm:$0xff] }
  0x5c   : > { %311 = vst [vmem:[%s835_s22 + $0xc8] sm:$0xff] %v183_v25  ;;  %v235_v13 = vld [vmem:[%s826_s28 + $0x268] sm:$0xff]  ;;  %v236_v14 = vld [vmem:[%s826_s28 + $0x270] sm:$0xff]  ;;  %v237_v15 = vld [vmem:[%s826_s28 + $0x278] sm:$0xff] }
  0x5d   : > { %312 = vst [vmem:[%s835_s22 + $0xd0] sm:$0xff] %v184_v26  ;;  %v238_v16 = vld [vmem:[%s826_s28 + $0x280] sm:$0xff]  ;;  %v239_v17 = vld [vmem:[%s826_s28 + $0x288] sm:$0xff]  ;;  %v240_v18 = vld [vmem:[%s826_s28 + $0x290] sm:$0xff] }
  0x5e   : > { %313 = vst [vmem:[%s835_s22 + $0xd8] sm:$0xff] %v185_v27  ;;  %v241_v19 = vld [vmem:[%s826_s28 + $0x298] sm:$0xff]  ;;  %v242_v20 = vld [vmem:[%s826_s28 + $0x2a0] sm:$0xff]  ;;  %v243_v21 = vld [vmem:[%s826_s28 + $0x2a8] sm:$0xff] }
  0x5f   : > { %314 = vst [vmem:[%s835_s22 + $0xe0] sm:$0xff] %v186_v28  ;;  %v244_v22 = vld [vmem:[%s826_s28 + $0x2b0] sm:$0xff]  ;;  %v245_v23 = vld [vmem:[%s826_s28 + $0x2b8] sm:$0xff]  ;;  %v246_v24 = vld [vmem:[%s826_s28 + $0x2c0] sm:$0xff] }
  0x60   : > { %315 = vst [vmem:[%s835_s22 + $0xe8] sm:$0xff] %v187_v29  ;;  %v247_v25 = vld [vmem:[%s826_s28 + $0x2c8] sm:$0xff]  ;;  %v248_v26 = vld [vmem:[%s826_s28 + $0x2d0] sm:$0xff]  ;;  %v249_v27 = vld [vmem:[%s826_s28 + $0x2d8] sm:$0xff] }
  0x61   : > { %316 = vst [vmem:[%s835_s22 + $0xf0] sm:$0xff] %v188_v30  ;;  %v250_v28 = vld [vmem:[%s826_s28 + $0x2e0] sm:$0xff]  ;;  %v251_v29 = vld [vmem:[%s826_s28 + $0x2e8] sm:$0xff]  ;;  %v252_v30 = vld [vmem:[%s826_s28 + $0x2f0] sm:$0xff] }
  0x62   : > { %317 = vst [vmem:[%s835_s22 + $0xf8] sm:$0xff] %v189_v31  ;;  %v253_v31 = vld [vmem:[%s826_s28 + $0x2f8] sm:$0xff] }
  0x63   : > { %318 = vst [vmem:[%s835_s22 + $0x100] sm:$0xff] %v190_v32  ;;  %v254_v32 = vld [vmem:[%s826_s28 + $0x300] sm:$0xff] }
  0x64   : > { %319 = vst [vmem:[%s835_s22 + $0x108] sm:$0xff] %v191_v33  ;;  %v255_v33 = vld [vmem:[%s826_s28 + $0x308] sm:$0xff] }
  0x65   : > { %320 = vst [vmem:[%s835_s22 + $0x110] sm:$0xff] %v192_v34  ;;  %v256_v34 = vld [vmem:[%s826_s28 + $0x310] sm:$0xff] }
  0x66   : > { %321 = vst [vmem:[%s835_s22 + $0x118] sm:$0xff] %v193_v35  ;;  %v257_v35 = vld [vmem:[%s826_s28 + $0x318] sm:$0xff] }
  0x67   : > { %322 = vst [vmem:[%s835_s22 + $0x120] sm:$0xff] %v194_v36  ;;  %v258_v36 = vld [vmem:[%s826_s28 + $0x320] sm:$0xff] }
  0x68   : > { %323 = vst [vmem:[%s835_s22 + $0x128] sm:$0xff] %v195_v37  ;;  %v259_v37 = vld [vmem:[%s826_s28 + $0x328] sm:$0xff] }
  0x69   : > { %324 = vst [vmem:[%s835_s22 + $0x130] sm:$0xff] %v196_v38  ;;  %v260_v38 = vld [vmem:[%s826_s28 + $0x330] sm:$0xff] }
  0x6a   : > { %325 = vst [vmem:[%s835_s22 + $0x138] sm:$0xff] %v197_v39  ;;  %v261_v39 = vld [vmem:[%s826_s28 + $0x338] sm:$0xff] }
  0x6b   : > { %326 = vst [vmem:[%s835_s22 + $0x140] sm:$0xff] %v198_v40  ;;  %v262_v40 = vld [vmem:[%s826_s28 + $0x340] sm:$0xff] }
  0x6c   : > { %327 = vst [vmem:[%s835_s22 + $0x148] sm:$0xff] %v199_v41  ;;  %v263_v41 = vld [vmem:[%s826_s28 + $0x348] sm:$0xff] }
  0x6d   : > { %328 = vst [vmem:[%s835_s22 + $0x150] sm:$0xff] %v200_v42  ;;  %v264_v42 = vld [vmem:[%s826_s28 + $0x350] sm:$0xff] }
  0x6e   : > { %329 = vst [vmem:[%s835_s22 + $0x158] sm:$0xff] %v201_v43  ;;  %v265_v43 = vld [vmem:[%s826_s28 + $0x358] sm:$0xff] }
  0x6f   : > { %330 = vst [vmem:[%s835_s22 + $0x160] sm:$0xff] %v202_v44  ;;  %v266_v44 = vld [vmem:[%s826_s28 + $0x360] sm:$0xff] }
  0x70   : > { %331 = vst [vmem:[%s835_s22 + $0x168] sm:$0xff] %v203_v45  ;;  %v267_v45 = vld [vmem:[%s826_s28 + $0x368] sm:$0xff] }
  0x71   : > { %332 = vst [vmem:[%s835_s22 + $0x170] sm:$0xff] %v204_v46  ;;  %v268_v46 = vld [vmem:[%s826_s28 + $0x370] sm:$0xff] }
  0x72   : > { %333 = vst [vmem:[%s835_s22 + $0x178] sm:$0xff] %v205_v47  ;;  %v269_v47 = vld [vmem:[%s826_s28 + $0x378] sm:$0xff] }
  0x73   : > { %334 = vst [vmem:[%s835_s22 + $0x180] sm:$0xff] %v206_v48  ;;  %v270_v48 = vld [vmem:[%s826_s28 + $0x380] sm:$0xff] }
  0x74   : > { %335 = vst [vmem:[%s835_s22 + $0x188] sm:$0xff] %v207_v49  ;;  %v271_v49 = vld [vmem:[%s826_s28 + $0x388] sm:$0xff] }
  0x75   : > { %336 = vst [vmem:[%s835_s22 + $0x190] sm:$0xff] %v208_v50  ;;  %v272_v50 = vld [vmem:[%s826_s28 + $0x390] sm:$0xff] }
  0x76   : > { %337 = vst [vmem:[%s835_s22 + $0x198] sm:$0xff] %v209_v51  ;;  %v273_v51 = vld [vmem:[%s826_s28 + $0x398] sm:$0xff] }
  0x77   : > { %338 = vst [vmem:[%s835_s22 + $0x1a0] sm:$0xff] %v210_v52  ;;  %v274_v52 = vld [vmem:[%s826_s28 + $0x3a0] sm:$0xff] }
  0x78   : > { %339 = vst [vmem:[%s835_s22 + $0x1a8] sm:$0xff] %v211_v53  ;;  %v275_v53 = vld [vmem:[%s826_s28 + $0x3a8] sm:$0xff] }
  0x79   : > { %340 = vst [vmem:[%s835_s22 + $0x1b0] sm:$0xff] %v212_v54  ;;  %v276_v54 = vld [vmem:[%s826_s28 + $0x3b0] sm:$0xff] }
  0x7a   : > { %341 = vst [vmem:[%s835_s22 + $0x1b8] sm:$0xff] %v213_v55  ;;  %v277_v55 = vld [vmem:[%s826_s28 + $0x3b8] sm:$0xff] }
  0x7b   : > { %342 = vst [vmem:[%s835_s22 + $0x1c0] sm:$0xff] %v214_v56  ;;  %v278_v56 = vld [vmem:[%s826_s28 + $0x3c0] sm:$0xff] }
  0x7c   : > { %343 = vst [vmem:[%s835_s22 + $0x1c8] sm:$0xff] %v215_v57  ;;  %v279_v57 = vld [vmem:[%s826_s28 + $0x3c8] sm:$0xff] }
  0x7d   : > { %344 = vst [vmem:[%s835_s22 + $0x1d0] sm:$0xff] %v216_v58  ;;  %v280_v58 = vld [vmem:[%s826_s28 + $0x3d0] sm:$0xff] }
  0x7e   : > { %345 = vst [vmem:[%s835_s22 + $0x1d8] sm:$0xff] %v217_v59  ;;  %v281_v59 = vld [vmem:[%s826_s28 + $0x3d8] sm:$0xff] }
  0x7f   : > { %346 = vst [vmem:[%s835_s22 + $0x1e0] sm:$0xff] %v218_v60  ;;  %v282_v60 = vld [vmem:[%s826_s28 + $0x3e0] sm:$0xff] }
  0x80   : > { %347 = vst [vmem:[%s835_s22 + $0x1e8] sm:$0xff] %v219_v61  ;;  %v283_v61 = vld [vmem:[%s826_s28 + $0x3e8] sm:$0xff] }
  0x81   : > { %348 = vst [vmem:[%s835_s22 + $0x1f0] sm:$0xff] %v220_v62  ;;  %v284_v62 = vld [vmem:[%s826_s28 + $0x3f0] sm:$0xff] }
  0x82   : > { %349 = vst [vmem:[%s835_s22 + $0x1f8] sm:$0xff] %v221_v63  ;;  %v285_v63 = vld [vmem:[%s826_s28 + $0x3f8] sm:$0xff] }
  0x83   : > { %350 = vst [vmem:[%s835_s22 + $0x200] sm:$0xff] %v222_v0 }
  0x84   : > { %351 = vst [vmem:[%s835_s22 + $0x208] sm:$0xff] %v223_v1 }
  0x85   : > { %352 = vst [vmem:[%s835_s22 + $0x210] sm:$0xff] %v224_v2 }
  0x86   : > { %353 = vst [vmem:[%s835_s22 + $0x218] sm:$0xff] %v225_v3 }
  0x87   : > { %354 = vst [vmem:[%s835_s22 + $0x220] sm:$0xff] %v226_v4 }
  0x88   : > { %355 = vst [vmem:[%s835_s22 + $0x228] sm:$0xff] %v227_v5 }
  0x89   : > { %356 = vst [vmem:[%s835_s22 + $0x230] sm:$0xff] %v228_v6 }
  0x8a   : > { %357 = vst [vmem:[%s835_s22 + $0x238] sm:$0xff] %v229_v7 }
  0x8b   : > { %358 = vst [vmem:[%s835_s22 + $0x240] sm:$0xff] %v230_v8 }
  0x8c   : > { %359 = vst [vmem:[%s835_s22 + $0x248] sm:$0xff] %v231_v9 }
  0x8d   : > { %360 = vst [vmem:[%s835_s22 + $0x250] sm:$0xff] %v232_v10 }
  0x8e   : > { %361 = vst [vmem:[%s835_s22 + $0x258] sm:$0xff] %v233_v11 }
  0x8f   : > { %362 = vst [vmem:[%s835_s22 + $0x260] sm:$0xff] %v234_v12 }
  0x90   : > { %363 = vst [vmem:[%s835_s22 + $0x268] sm:$0xff] %v235_v13 }
  0x91   : > { %364 = vst [vmem:[%s835_s22 + $0x270] sm:$0xff] %v236_v14 }
  0x92   : > { %365 = vst [vmem:[%s835_s22 + $0x278] sm:$0xff] %v237_v15 }
  0x93   : > { %366 = vst [vmem:[%s835_s22 + $0x280] sm:$0xff] %v238_v16 }
  0x94   : > { %367 = vst [vmem:[%s835_s22 + $0x288] sm:$0xff] %v239_v17 }
  0x95   : > { %368 = vst [vmem:[%s835_s22 + $0x290] sm:$0xff] %v240_v18 }
  0x96   : > { %369 = vst [vmem:[%s835_s22 + $0x298] sm:$0xff] %v241_v19 }
  0x97   : > { %370 = vst [vmem:[%s835_s22 + $0x2a0] sm:$0xff] %v242_v20 }
  0x98   : > { %371 = vst [vmem:[%s835_s22 + $0x2a8] sm:$0xff] %v243_v21 }
  0x99   : > { %372 = vst [vmem:[%s835_s22 + $0x2b0] sm:$0xff] %v244_v22 }
  0x9a   : > { %373 = vst [vmem:[%s835_s22 + $0x2b8] sm:$0xff] %v245_v23 }
  0x9b   : > { %374 = vst [vmem:[%s835_s22 + $0x2c0] sm:$0xff] %v246_v24 }
  0x9c   : > { %375 = vst [vmem:[%s835_s22 + $0x2c8] sm:$0xff] %v247_v25 }
  0x9d   : > { %376 = vst [vmem:[%s835_s22 + $0x2d0] sm:$0xff] %v248_v26 }
  0x9e   : > { %377 = vst [vmem:[%s835_s22 + $0x2d8] sm:$0xff] %v249_v27 }
  0x9f   : > { %378 = vst [vmem:[%s835_s22 + $0x2e0] sm:$0xff] %v250_v28 }
  0xa0   : > { %379 = vst [vmem:[%s835_s22 + $0x2e8] sm:$0xff] %v251_v29 }
  0xa1   : > { %380 = vst [vmem:[%s835_s22 + $0x2f0] sm:$0xff] %v252_v30 }
  0xa2   : > { %381 = vst [vmem:[%s835_s22 + $0x2f8] sm:$0xff] %v253_v31 }
  0xa3   : > { %382 = vst [vmem:[%s835_s22 + $0x300] sm:$0xff] %v254_v32 }
  0xa4   : > { %383 = vst [vmem:[%s835_s22 + $0x308] sm:$0xff] %v255_v33 }
  0xa5   : > { %384 = vst [vmem:[%s835_s22 + $0x310] sm:$0xff] %v256_v34 }
  0xa6   : > { %385 = vst [vmem:[%s835_s22 + $0x318] sm:$0xff] %v257_v35 }
  0xa7   : > { %386 = vst [vmem:[%s835_s22 + $0x320] sm:$0xff] %v258_v36 }
  0xa8   : > { %387 = vst [vmem:[%s835_s22 + $0x328] sm:$0xff] %v259_v37 }
  0xa9   : > { %388 = vst [vmem:[%s835_s22 + $0x330] sm:$0xff] %v260_v38 }
  0xaa   : > { %389 = vst [vmem:[%s835_s22 + $0x338] sm:$0xff] %v261_v39 }
  0xab   : > { %390 = vst [vmem:[%s835_s22 + $0x340] sm:$0xff] %v262_v40 }
  0xac   : > { %391 = vst [vmem:[%s835_s22 + $0x348] sm:$0xff] %v263_v41 }
  0xad   : > { %392 = vst [vmem:[%s835_s22 + $0x350] sm:$0xff] %v264_v42 }
  0xae   : > { %393 = vst [vmem:[%s835_s22 + $0x358] sm:$0xff] %v265_v43 }
  0xaf   : > { %394 = vst [vmem:[%s835_s22 + $0x360] sm:$0xff] %v266_v44 }
  0xb0   : > { %395 = vst [vmem:[%s835_s22 + $0x368] sm:$0xff] %v267_v45 }
  0xb1   : > { %396 = vst [vmem:[%s835_s22 + $0x370] sm:$0xff] %v268_v46 }
  0xb2   : > { %397 = vst [vmem:[%s835_s22 + $0x378] sm:$0xff] %v269_v47 }
  0xb3   : > { %398 = vst [vmem:[%s835_s22 + $0x380] sm:$0xff] %v270_v48 }
  0xb4   : > { %399 = vst [vmem:[%s835_s22 + $0x388] sm:$0xff] %v271_v49 }
  0xb5   : > { %400 = vst [vmem:[%s835_s22 + $0x390] sm:$0xff] %v272_v50 }
  0xb6   : > { %401 = vst [vmem:[%s835_s22 + $0x398] sm:$0xff] %v273_v51 }
  0xb7   : > { %402 = vst [vmem:[%s835_s22 + $0x3a0] sm:$0xff] %v274_v52 }
  0xb8   : > { %403 = vst [vmem:[%s835_s22 + $0x3a8] sm:$0xff] %v275_v53 }
  0xb9   : > { %404 = vst [vmem:[%s835_s22 + $0x3b0] sm:$0xff] %v276_v54 }
  0xba   : > { %405 = vst [vmem:[%s835_s22 + $0x3b8] sm:$0xff] %v277_v55 }
  0xbb   : > { %406 = vst [vmem:[%s835_s22 + $0x3c0] sm:$0xff] %v278_v56 }
  0xbc   : > { %407 = vst [vmem:[%s835_s22 + $0x3c8] sm:$0xff] %v279_v57 }
  0xbd   : > { %408 = vst [vmem:[%s835_s22 + $0x3d0] sm:$0xff] %v280_v58 }
  0xbe   : > { %409 = vst [vmem:[%s835_s22 + $0x3d8] sm:$0xff] %v281_v59  ;;  %421 = sbr.rel (!%p765_p9) target bundleno = 226 (0xe2), region = 32 }
  0xbf   : > { %410 = vst [vmem:[%s835_s22 + $0x3e0] sm:$0xff] %v282_v60 }
  0xc0   : > { %411 = vst [vmem:[%s835_s22 + $0x3e8] sm:$0xff] %v283_v61 }
  0xc1   : > { %412 = vst [vmem:[%s835_s22 + $0x3f0] sm:$0xff] %v284_v62 }
  0xc2   : > { %413 = vst [vmem:[%s835_s22 + $0x3f8] sm:$0xff] %v285_v63 }
  0xc3   : > { %s1166_s4 = smov (!%p424_p6, %s423_s4), 4 }
  0xc4   : > { %s541_s5 = sshll.u32 %s1166_s4, 8 }
  0xc5   : > { %s428_s11 = ssub.s32 1024, %s541_s5 }
  0xc6   : > { %s429_s21 = sshll.u32 %s428_s11, 4 }
  0xc7   : > { %430 = vsyncadd %s415_s16, %s429_s21  ;;  %p1099_p13 = scmp.ne.s32.totalorder %s541_s5, 0  ;;  %s543_s23 = sshll.u32 %s742_s10, 10 }
  0xc8   : > { %s434_s27 = scalar_lea.hbm %s1153_s1, %s543_s23  ;;  %s436_s29 = sshll.u32 %s835_s22, 4  ;;  %s1108_s29 = int_to_ptr.vmem [resolvable:$true] %s436_s29 }
  0xc9   : > { %s438_s30 = sshll.u32 %s434_s27, 4  ;;  %s535_s2 = sshll.u32 %s1166_s4, 12  ;;  %s1110_s30 = int_to_ptr.hbm [resolvable:$true] %s438_s30 }
  0xca   : > { %s626_s3 = sshra.s32 %s1108_s29, 4  ;;  %s628_s13 = sshrl.u32 %s535_s2, 4  ;;  %s627_s3 = int_to_ptr.vmem [resolvable:$true] %s626_s3 }
  0xcb   : > { %s633_s19 = scalar_lea.vmem %s627_s3, %s628_s13  ;;  %s708_s10 = smov [#allocation5]  }
  0xcc   : > { %p634_p9 = scmp.ne.s32.totalorder %s627_s3, %s633_s19  ;;  %s637_s20 = scalar_lea.vmem %s708_s10, 2048 }
  0xcd   : > { %p639_p8 = scmp.lt.s32.totalorder %s637_s20, %s633_s19 }
  0xce   : > { %p635_p5 = pnand %p634_p9, %p1099_p13 }
  0xd0   : > { %p636_p7 = pneg %p635_p5 }
  0xd2   : > { %p641_p11 = pnand %p639_p8, %p636_p7 }
  0xd4   : > { %644 = shalt.err (!%p641_p11)
}
  0xd5   : > { %s645_s28 = sshra.s32 %s1110_s30, 4  ;;  %s656_s11 = scalar_lea.hbm %s1153_s1, 2304  ;;  %s646_s28 = int_to_ptr.hbm [resolvable:$true] %s645_s28 }
  0xd6   : > { %s652_s22 = scalar_lea.hbm %s646_s28, %s628_s13  ;;  %p657_p2 = scmp.lt.s32.totalorder %s646_s28, %s1153_s1 }
  0xd7   : > { %p653_p12 = scmp.ne.s32.totalorder %s646_s28, %s652_s22  ;;  %p658_p3 = scmp.lt.s32.totalorder %s656_s11, %s652_s22 }
  0xd9   : > { %p654_p0 = pnand %p653_p12, %p1099_p13  ;;  %p659_p4 = por %p658_p3, %p657_p2 }
  0xdb   : > { %p655_p1 = pneg %p654_p0 }
  0xdd   : > { %p660_p6 = pnand %p659_p4, %p655_p1 }
  0xdf   : > { %663 = shalt.err (!%p660_p6)
}
  0xe0   : > { %s709_s24 = smov 4096   ;;  %s710_s25 = smov 256  }
  0xe1   : > { %444 = dma.vmem_to_hbm [thread:$0]  (%p1099_p13), %s1108_s29, %s535_s2, %s1110_s30, %s415_s16, %s709_s24, %s709_s24, %s710_s25  }
  0xe2 PF: > { %p550_p9 = scmp.ge.s32.totalorder %s703_s9, 2  ;;  %s453_s27 = sand.u32 1, %s691_s6  }
  0xe3   : > { %s454_s3 = scalar_lea.sflag [#allocation4], %s453_s27 }
  0xe4   : > { %p547_p5 = pnand %p550_p9, %p769_p10 }
  0xe6   : > { %p548_p7 = pneg %p547_p5 }
  0xe8   : > { %686 = dma.done.wait (%p548_p7), %s454_s3, 16384  }
  0xe9   : > { %688 = vsyncadd (%p548_p7), %s454_s3, 4294950912  ;;  %p14_p8 = scmp.ge.s32.totalorder %s746_s12, 5   ;;  %s1159_s6 = smov %s695_s7 }
  0xea   : > { %s1160_s7 = smov %s699_s8  ;;  %s1161_s8 = smov %s758_s15 }
  0xeb   : > { %s1162_s9 = smov %s746_s12  ;;  %16 = sbr.rel (!%p14_p8) target bundleno = 5 (0x5), region = 69 }
  0xf0   :  { %460 = vsyncpa [#allocation3], 1 }
  0xf1   :  { %462 = vsyncpa [#allocation3 + $0x1], 1 }
  0xf2   :  { %463 = vsyncpa [#allocation4], 1 }
  0xf3   :  { %465 = vsyncpa [#allocation4 + $0x1], 1 }

</bundles_post_ra>
